<compile_context>
chip_gen: v7x
topology: tpu7x:2x2x1
jax: 0.10.0
libtpu: 0.0.40
codegen_flags: <defaults>
</compile_context>

<pallas_src>
import functools
import math

import jax
import jax.numpy as jnp
from jax.experimental import pallas as pl
from jax.experimental.pallas import tpu as pltpu


def _round_up(a, b):
    return pl.cdiv(a, b) * b


def _fold_bn(weight_oihw, gamma, beta, running_mean, running_var, eps):
    """Fold inference-mode BatchNorm into the 1x1 conv weight.

    Returns (w_folded bf16 of shape (C_out, C_in), bias f32 of shape (C_out,)).
    """
    C_out, C_in, KH, KW = weight_oihw.shape
    assert KH == 1 and KW == 1, "CustomBlock uses a 1x1 convolution"
    w = weight_oihw.reshape(C_out, C_in).astype(jnp.float32)
    scale = gamma.astype(jnp.float32) / jnp.sqrt(
        running_var.astype(jnp.float32) + eps)
    bias = beta.astype(jnp.float32) - running_mean.astype(jnp.float32) * scale
    w_folded = (w * scale[:, None]).astype(jnp.bfloat16)
    return w_folded, bias


def _pick_tiles(M, C_in, C_out):
    """Choose (tn, C_out_pad, tm, M_pad) under a VMEM budget (all Python ints)."""
    c8 = _round_up(C_out, 8)
    # Cover all output channels in one tile when reasonable -> x read from HBM
    # exactly once; otherwise fall back to the MXU-native 256.
    tn = c8 if c8 <= 512 else 256
    C_out_pad = _round_up(c8, tn)

    # Per-step VMEM (bytes): double-buffered f32 x tile + bf16 cast temp,
    # double-buffered f32 out tile + f32 acc temp, double-buffered bf16 weight.
    budget = 24 * 1024 * 1024
    w_bytes = 2 * 2 * tn * C_in
    per_lane = 10 * C_in + 12 * tn
    tm_cap = (max(budget - w_bytes, 0) // per_lane) // 128 * 128
    tm_cap = int(min(max(tm_cap, 128), 2048))

    def _largest_dividing_tile(total):
        best, t = 128, 128
        while t <= min(tm_cap, total):
            if total % t == 0:
                best = t
            t += 128
        return best

    if M % 128 == 0:
        tm, M_pad = _largest_dividing_tile(M), M            # no pad, no slice
    elif M <= tm_cap:
        tm, M_pad = M, M                                    # full-extent block
    else:
        # TODO(synk): ragged large H*W forces an HBM pad copy of the activation.
        M_pad = _round_up(M, 128)
        tm = _largest_dividing_tile(M_pad)
    return tn, C_out_pad, tm, M_pad


def _pw_conv_bn_relu_kernel(x_ref, w_ref, b_ref, o_ref):
    """Fused 1x1-conv GEMM + folded-BN bias + ReLU for one tile.

    x_ref: (1, C_in, tm) f32  activation slab (cast to bf16 in VMEM)
    w_ref: (tn, C_in)    bf16 folded weight (BN scale already applied)
    b_ref: (tn, 1)       f32  folded BN bias
    o_ref: (1, tn, tm)   f32  output tile (lane-dense along H*W)
    """
    x = x_ref[0].astype(jnp.bfloat16)                                  # (C_in, tm)
    acc = jnp.dot(w_ref[...], x, preferred_element_type=jnp.float32)  # (tn, tm)
    o_ref[0] = jnp.maximum(acc + b_ref[...], 0.0).astype(o_ref.dtype)


@functools.partial(jax.jit, static_argnames=("eps",))
def custom_block_forward(x_nchw, weight_oihw, gamma, beta, running_mean,
                         running_var, *, eps=1e-5):
    """Forward of CustomBlock: ReLU(BN(Conv2d_1x1(x))) -- NCHW in, NCHW out."""
    N, C_in, H, W = x_nchw.shape
    C_out = weight_oihw.shape[0]

    w_folded, bias = _fold_bn(weight_oihw, gamma, beta, running_mean,
                              running_var, eps)

    # ---- layout glue (copy-free reshape, no transpose, no im2col) ----------
    M = H * W
    x = x_nchw.reshape(N, C_in, M).astype(jnp.float32)

    tn, C_out_pad, tm, M_pad = _pick_tiles(M, C_in, C_out)

    if M_pad != M:
        x = jnp.pad(x, ((0, 0), (0, 0), (0, M_pad - M)))
    if C_out_pad != C_out:
        w_folded = jnp.pad(w_folded, ((0, C_out_pad - C_out), (0, 0)))
        bias = jnp.pad(bias, (0, C_out_pad - C_out))
    bias2d = bias.reshape(C_out_pad, 1)

    # ni outermost: weight/bias blocks stay resident across all (b, mi) steps.
    grid = (C_out_pad // tn, N, M_pad // tm)

    out = pl.pallas_call(
        _pw_conv_bn_relu_kernel,
        out_shape=jax.ShapeDtypeStruct((N, C_out_pad, M_pad), jnp.float32),
        grid_spec=pltpu.PrefetchScalarGridSpec(
            num_scalar_prefetch=0,
            grid=grid,
            in_specs=[
                pl.BlockSpec((1, C_in, tm), lambda ni, b, mi: (b, 0, mi)),
                pl.BlockSpec((tn, C_in), lambda ni, b, mi: (ni, 0)),
                pl.BlockSpec((tn, 1), lambda ni, b, mi: (ni, 0)),
            ],
            out_specs=pl.BlockSpec((1, tn, tm), lambda ni, b, mi: (b, ni, mi)),
        ),
        compiler_params=pltpu.CompilerParams(
            # Every output block is written exactly once -> all axes parallel
            # (lets megacore shard the batch / spatial / channel tiles).
            dimension_semantics=("parallel", "parallel", "parallel"),
            # Headroom above the 16/32 MiB scoped defaults; tile budget keeps
            # the real footprint well under this (and under v7x's 64 MiB).
            vmem_limit_bytes=48 * 1024 * 1024,
        ),
    )(x, w_folded, bias2d)

    out = out[:, :C_out, :M].reshape(N, C_out, H, W)
    return out


def _reference_f32(x, w, gamma, beta, mean, var, eps=1e-5):
    """Plain-JAX full-precision reference (conv -> BN eval -> relu)."""
    y = jax.lax.conv_general_dilated(
        x, w, window_strides=(1, 1), padding="VALID",
        dimension_numbers=("NCHW", "OIHW", "NCHW"),
        precision=jax.lax.Precision.HIGHEST)
    s = (gamma / jnp.sqrt(var + eps)).reshape(1, -1, 1, 1)
    b = (beta - mean * gamma / jnp.sqrt(var + eps)).reshape(1, -1, 1, 1)
    return jnp.maximum(y * s + b, 0.0)


if __name__ == "__main__":
    # Small shapes consistent with CustomBlock(in_d=4, out_d=8).
    N, C_in, H, W = 2, 4, 16, 16
    C_out = 8
    eps = 1e-5

    key = jax.random.PRNGKey(0)
    kx, kw, kg, kb, km, kv = jax.random.split(key, 6)

    x = jax.random.normal(kx, (N, C_in, H, W), dtype=jnp.float32)

    stdv = 1.0 / math.sqrt(C_in * 1 * 1)
    weight = jax.random.uniform(kw, (C_out, C_in, 1, 1),
                                minval=-stdv, maxval=stdv, dtype=jnp.float32)

    # Non-trivial (deterministic) BatchNorm affine params / running stats so
    # the BN fold is actually exercised.  TODO(synk): training-mode BatchNorm
    # (batch statistics + running-stat update) is not implemented; this is
    # inference (module.eval()) semantics.
    gamma = jax.random.uniform(kg, (C_out,), minval=0.5, maxval=1.5,
                               dtype=jnp.float32)
    beta = 0.1 * jax.random.normal(kb, (C_out,), dtype=jnp.float32)
    running_mean = 0.1 * jax.random.normal(km, (C_out,), dtype=jnp.float32)
    running_var = jax.random.uniform(kv, (C_out,), minval=0.5, maxval=1.5,
                                     dtype=jnp.float32)

    out = custom_block_forward(x, weight, gamma, beta, running_mean,
                               running_var, eps=eps)
    out = jax.block_until_ready(out)
    assert out.shape == (N, C_out, H, W), out.shape

    # Tight check against a reference that uses the same bf16-quantized
    # operands as the kernel (f32 accumulation) -> catches tiling/index bugs.
    wq, bq = _fold_bn(weight, gamma, beta, running_mean, running_var, eps)
    xq = x.astype(jnp.bfloat16).astype(jnp.float32)
    ref_q = jnp.maximum(
        jnp.einsum("oi,nihw->nohw", wq.astype(jnp.float32), xq,
                   precision=jax.lax.Precision.HIGHEST)
        + bq.reshape(1, C_out, 1, 1), 0.0)
    assert jnp.allclose(out, ref_q, atol=1e-4, rtol=1e-4), \
        float(jnp.max(jnp.abs(out - ref_q)))

    # Loose check against the full-precision module semantics (bf16 operand
    # quantization is the only difference).
    ref = _reference_f32(x, weight, gamma, beta, running_mean, running_var,
                         eps=eps)
    assert jnp.allclose(out, ref, atol=7.5e-2, rtol=5e-2), \
        float(jnp.max(jnp.abs(out - ref)))

    print("KERNEL_OK")
</pallas_src>

<mosaic_0001>
module attributes {stable_mosaic.version = 11 : i64} {
  func.func @_pw_conv_bn_relu_kernel(%arg0: i32, %arg1: i32, %arg2: i32, %arg3: memref<1x4x256xf32, #tpu.memory_space<vmem>>, %arg4: memref<8x4xbf16, #tpu.memory_space<vmem>>, %arg5: memref<8x1xf32, #tpu.memory_space<vmem>>, %arg6: memref<1x8x256xf32, #tpu.memory_space<vmem>>) attributes {dimension_semantics = [#tpu.dimension_semantics<parallel>, #tpu.dimension_semantics<parallel>, #tpu.dimension_semantics<parallel>], iteration_bounds = array<i64: 1, 2, 1>, scalar_prefetch = 0 : i64, scratch_operands = 0 : i64, tpu.core_type = #tpu.core_type<tc>, window_params = [{transform_indices = @transform_0, window_bounds = array<i64: 1, 4, 256>}, {transform_indices = @transform_1, window_bounds = array<i64: 8, 4>}, {transform_indices = @transform_2, window_bounds = array<i64: 8, 1>}, {transform_indices = @transform_3, window_bounds = array<i64: 1, 8, 256>}]} {
    %c0 = arith.constant 0 : index
    %c0_0 = arith.constant 0 : index
    %c0_1 = arith.constant 0 : index
    %0 = vector.load %arg3[%c0, %c0_0, %c0_1] : memref<1x4x256xf32, #tpu.memory_space<vmem>>, vector<1x4x256xf32>
    %1 = vector.shape_cast %0 : vector<1x4x256xf32> to vector<4x256xf32>
    %2 = arith.truncf %1 : vector<4x256xf32> to vector<4x256xbf16>
    %c0_2 = arith.constant 0 : index
    %c0_3 = arith.constant 0 : index
    %3 = vector.load %arg4[%c0_2, %c0_3] : memref<8x4xbf16, #tpu.memory_space<vmem>>, vector<8x4xbf16>
    %cst = arith.constant dense<0.000000e+00> : vector<8x256xf32>
    %4 = tpu.matmul %3, %2, %cst {dimension_numbers = #tpu.dot_dimension_numbers<[1], [0], [0], [1], [0, 0, 1, 1], [], []>} : vector<8x4xbf16>, vector<4x256xbf16>, vector<8x256xf32> -> vector<8x256xf32>
    %c0_4 = arith.constant 0 : index
    %c0_5 = arith.constant 0 : index
    %5 = vector.load %arg5[%c0_4, %c0_5] : memref<8x1xf32, #tpu.memory_space<vmem>>, vector<8x1xf32>
    %6 = vector.broadcast %5 : vector<8x1xf32> to vector<8x256xf32>
    %7 = arith.addf %4, %6 : vector<8x256xf32>
    %cst_6 = arith.constant 0.000000e+00 : f32
    %8 = vector.broadcast %cst_6 : f32 to vector<8x256xf32>
    %9 = arith.maximumf %7, %8 : vector<8x256xf32>
    %c0_7 = arith.constant 0 : index
    %c0_8 = arith.constant 0 : index
    %c0_9 = arith.constant 0 : index
    %10 = vector.load %arg6[%c0_7, %c0_8, %c0_9] : memref<1x8x256xf32, #tpu.memory_space<vmem>>, vector<1x8x256xf32>
    %11 = vector.shape_cast %10 : vector<1x8x256xf32> to vector<8x256xf32>
    %12 = vector.shape_cast %9 : vector<8x256xf32> to vector<1x8x256xf32>
    tpu.vector_store %arg6[%c0_7, %c0_8, %c0_9], %12 {strides = array<i32>} : memref<1x8x256xf32, #tpu.memory_space<vmem>>, vector<1x8x256xf32>,
    return
  }
  func.func @transform_0(%arg0: i32, %arg1: i32, %arg2: i32) -> (i32, i32, i32) {
    %c0_i32 = arith.constant 0 : i32
    %c0_i32_0 = arith.constant 0 : i32
    return %arg1, %c0_i32, %arg2 : i32, i32, i32
  }
  func.func @transform_1(%arg0: i32, %arg1: i32, %arg2: i32) -> (i32, i32) {
    %c0_i32 = arith.constant 0 : i32
    %c0_i32_0 = arith.constant 0 : i32
    return %arg0, %c0_i32 : i32, i32
  }
  func.func @transform_2(%arg0: i32, %arg1: i32, %arg2: i32) -> (i32, i32) {
    %c0_i32 = arith.constant 0 : i32
    %c0_i32_0 = arith.constant 0 : i32
    return %arg0, %c0_i32 : i32, i32
  }
  func.func @transform_3(%arg0: i32, %arg1: i32, %arg2: i32) -> (i32, i32, i32) {
    %c0_i32 = arith.constant 0 : i32
    return %arg1, %arg0, %arg2 : i32, i32, i32
  }
}

</mosaic_0001>

<bundles_post_ra>
// kernel: custom_block_forward.1
= control target key start
LH: loop header
LB: loop body
LE: loop exit
PB: predicated region body
PF: predicated region fallthrough
CT: control target
= control target key end

     0   :  { %s556_s12 = smov 0   ;;  %s558_s13 = smov 0   ;;  %s595_s0 = inlined_call_operand.vmem [shape: f32[2,4,256], index: 0, kind: input, shape index: {}]   ;;  %s596_s1 = inlined_call_operand.vmem [shape: bf16[8,4], index: 1, kind: input, shape index: {}]   ;;  %s597_s2 = inlined_call_operand.vmem [shape: f32[8,1], index: 2, kind: input, shape index: {}]   ;;  %s598_s3 = inlined_call_operand.vmem [shape: f32[2,8,256], index: 3, kind: output, shape index: {}]  }
   0x1   :  { %s560_s14 = smov 0  }
   0x2 LB: > { %s28_s15 = sadd.s32 1, %s529_s13  ;;  %p473_p0 = scmp.ge.s32.totalorder %s533_s14, 1  ;;  %s533_s14 = sphi %s560_s14, %s13_s14   ;;  %s529_s13 = sphi %s558_s13, %s600_s13   ;;  %s525_s12 = sphi %s556_s12, %s599_s12  }
   0x3   : > { %p30_p1 = scmp.ge.s32.totalorder %s28_s15, 2  ;;  %p185_p2 = scmp.lt.s32.totalorder %s533_s14, 3 }
   0x5   : > { %s602_s15 = smov (%p30_p1, %s28_s15), 0  ;;  %p186_p3 = pnand %p473_p0, %p185_p2 }
   0x6   : > { %p230_p4 = scmp.lt.s32.totalorder (!%p186_p3), %s525_s12, 1  ;;  %v535_v0 = vmov (!%p186_p3), 0   ;;  %v269_v1 = vld [vmem:[%s597_s2] sm:$0xff] (!%p186_p3)  ;;  %vm279_vm0 = vcmask (!%p186_p3), 1041408   ;;  %vm275_vm1 = vcmask (!%p186_p3), 31744  }
   0x7   : > { %189 = sbr.rel (%p186_p3) target bundleno = 244 (0xf4), region = 32  ;;  %318 = vmatprep.mubr.bf16.mxu0 (!%p186_p3), %v535_v0  ;;  %509 = vset.pattern.permute.xlu0 (!%p186_p3), %v535_v0  ;;  %v268_v7 = vld [vmem:[%s596_s1] sm:$0xf] (!%p186_p3) }
   0x8   : > { %272 = vperm.xlu0 (!%p186_p3), %509, %v269_v1  }
   0xe   : > { %s604_s12 = smov (!%p230_p4, %s525_s12), 1 }
   0xf   : > { %s482_s18 = sshll.u32 %s604_s12, 3  ;;  %s483_s24 = sshll.u32 %s604_s12, 4 }
  0x10   : > { %s237_s21 = scalar_lea.vmem %s595_s0, %s482_s18  ;;  %s259_s27 = scalar_lea.vmem %s598_s3, %s483_s24 }
  0x11   : > { %v262_v2 = vld [vmem:[%s237_s21] sm:$0xff] }
  0x12   : > { %v264_v3 = vcombine.high %v262_v2, %v262_v2  ;;  %v266_v4 = vpack.c.bf16 %v262_v2, %v262_v2 }
  0x14   : > { %v267_v5 = vpack.c.bf16 %v264_v3, %v264_v3  ;;  %v281_v6 = vsel %vm279_vm0, %v266_v4, 0 }
  0x16   : > { %478 = vmatprep.subr.msk.bf16.mxu0 %vm279_vm0, %v267_v5 }
  0x17   : > { %287 = vmatpush1.bf16.msra.mxu0 %v281_v6 }
  0x1a   : > { %479 = vmatmul.mubr.msk.bf16.vlgmr.msra.gmra.mrb[0].mxu0 %vm275_vm1, %v268_v7 }
  0x87   : > { %v273_v8 = vpop.permute.xlu0 %272 }
  0xed   : > { %v320_v9 = vpop.f32.mrb[0].mxu0 }
  0xee   : > { %v321_v10 = vadd.f32 %v320_v9, %v273_v8  ;;  %v322_v11 = vpop.f32.mrb[1].mxu0 }
  0xef   : > { %v323_v12 = vadd.f32 %v322_v11, %v273_v8  ;;  %v324_v13 = vpop.f32.mrb[2].mxu0 }
  0xf0   : > { %v327_v14 = vmax.f32 %v321_v10, 0.0  ;;  %v325_v15 = vpop.f32.mrb[3].mxu0 }
  0xf1   : > { %v328_v16 = vmax.f32 %v323_v12, 0.0 }
  0xf2   : > { %329 = vst [vmem:[%s259_s27] sm:$0xff] %v327_v14 }
  0xf3   : > { %330 = vst [vmem:[%s259_s27 + $0x8] sm:$0xff] %v328_v16 }
  0xf4 PF: > { %s13_s14 = sadd.s32 1, %s533_s14   ;;  %s599_s12 = smov %s529_s13 }
  0xf5   : > { %p10_p5 = scmp.ge.s32.totalorder %s13_s14, 4   ;;  %s600_s13 = smov %s602_s15 }
  0xf7   :  { %12 = sbr.rel (!%p10_p5) target bundleno = 2 (0x2), region = 68 }

</bundles_post_ra>
